<compile_context>
chip_gen: v5e
topology: v5e:2x2
jax: 0.10.0
libtpu: 0.0.40
codegen_flags: <defaults>
</compile_context>

<pallas_src>
import math

import jax
import jax.numpy as jnp
from jax.experimental import pallas as pl
from jax.experimental.pallas import tpu as pltpu

EMB = 128          # embedding_dim
HEAD = 8           # head_num
QKV = 16           # qkv_dim
LOGIT_CLIP = 10.0
SQRT_EMB = math.sqrt(EMB)
INV_SQRT_QKV = 1.0 / math.sqrt(QKV)
INV_SQRT_EMB = 1.0 / SQRT_EMB


def _round_up(x, m):
    return ((x + m - 1) // m) * m


# ---------------------------------------------------------------------------
# Pallas kernel: one grid step = (batch element, POMO tile), whole decoder tail.
# ---------------------------------------------------------------------------
def _decoder_kernel(q_ref, k_ref, vc_ref, shk_ref, mask_ref, bc_ref, out_ref):
    mask = mask_ref[...]                                        # (TP, G)

    # Multi-head attention scores, batched over heads (canonical (h,m,k)x(h,k,n)).
    s = jnp.einsum('hpd,hdg->hpg', q_ref[...], k_ref[...],
                   preferred_element_type=jnp.float32)          # (H, TP, G)
    s = s * INV_SQRT_QKV + mask[None, :, :]
    # Per-head softmax: scores are unbounded -> keep the max-subtraction here.
    # NOTE: like the PyTorch original, a fully -inf mask row yields NaN (caller must
    # guarantee at least one feasible node per (batch, pomo) row).
    s = s - jnp.max(s, axis=-1, keepdims=True)
    e = jnp.exp(s)
    w = e * pl.reciprocal(jnp.sum(e, axis=-1, keepdims=True), approx=True)

    # Attention output with multi_head_combine folded into vc (K=G, N=EMB per head);
    # summing the leading head axis replaces concat + combine matmul.
    ho = jnp.einsum('hpg,hge->hpe', w, vc_ref[...],
                    preferred_element_type=jnp.float32)         # (H, TP, EMB)
    mh = jnp.sum(ho, axis=0) + bc_ref[...]                      # (TP, EMB)

    # Single-head scoring against the whole graph + logit clipping + final softmax.
    score = jnp.dot(mh, shk_ref[...], preferred_element_type=jnp.float32)   # (TP, G)
    score = LOGIT_CLIP * jnp.tanh(score * INV_SQRT_EMB) + mask
    # Logits are bounded to [-10, 10] (or -inf) -> no max-subtraction needed.
    e2 = jnp.exp(score)
    out_ref[...] = e2 * pl.reciprocal(jnp.sum(e2, axis=-1, keepdims=True), approx=True)


def pomo_decoder_forward(encoded_last_node, ninf_mask, q_first, k_t, v_comb,
                         single_head_key, wq_last, b_combine, *, pomo_tile=128):
    B, POMO, _ = encoded_last_node.shape
    G = ninf_mask.shape[-1]

    # Hoisted q projection (review suggestion): one batched matmul fused with q_first add.
    q = q_first + reshape_by_heads(encoded_last_node @ wq_last, HEAD)   # (B, H, POMO, QKV)

    # Pad G to a lane-dense multiple of 128 and POMO to the tile size.
    G_pad = _round_up(G, 128)
    if POMO <= pomo_tile:
        P_pad = _round_up(POMO, 8)
        TP = P_pad
    else:
        P_pad = _round_up(POMO, pomo_tile)
        TP = pomo_tile

    q_p = jnp.pad(q, ((0, 0), (0, 0), (0, P_pad - POMO), (0, 0)))
    k_p = jnp.pad(k_t, ((0, 0), (0, 0), (0, 0), (0, G_pad - G)))
    v_p = jnp.pad(v_comb, ((0, 0), (0, 0), (0, G_pad - G), (0, 0)))
    shk_p = jnp.pad(single_head_key, ((0, 0), (0, 0), (0, G_pad - G)))
    # Padded graph columns get -inf (=> probability exactly 0); padded POMO rows get 0
    # (finite math, sliced off afterwards).
    mask_p = jnp.pad(ninf_mask, ((0, 0), (0, 0), (0, G_pad - G)),
                     constant_values=-jnp.inf)
    mask_p = jnp.pad(mask_p, ((0, 0), (0, P_pad - POMO), (0, 0)))
    b_c = b_combine.reshape(1, EMB)

    out = pl.pallas_call(
        _decoder_kernel,
        out_shape=jax.ShapeDtypeStruct((B, P_pad, G_pad), jnp.float32),
        grid_spec=pltpu.PrefetchScalarGridSpec(
            num_scalar_prefetch=0,
            grid=(B, P_pad // TP),
            in_specs=[
                pl.BlockSpec((None, HEAD, TP, QKV), lambda b, p: (b, 0, p, 0)),     # q
                pl.BlockSpec((None, HEAD, QKV, G_pad), lambda b, p: (b, 0, 0, 0)),  # k_t
                pl.BlockSpec((None, HEAD, G_pad, EMB), lambda b, p: (b, 0, 0, 0)),  # v_comb
                pl.BlockSpec((None, EMB, G_pad), lambda b, p: (b, 0, 0)),           # shk
                pl.BlockSpec((None, TP, G_pad), lambda b, p: (b, p, 0)),            # mask
                pl.BlockSpec((1, EMB), lambda b, p: (0, 0)),                        # bias
            ],
            out_specs=pl.BlockSpec((None, TP, G_pad), lambda b, p: (b, p, 0)),
        ),
        compiler_params=pltpu.CompilerParams(
            dimension_semantics=("parallel", "parallel"),
            vmem_limit_bytes=48 * 1024 * 1024,
        ),
    )(q_p, k_p, v_p, shk_p, mask_p, b_c)

    return out[:, :POMO, :G]


# ---------------------------------------------------------------------------
# Plain-JAX glue reproducing set_kv / set_q1 (one-time parameter setup, not hot path).
# ---------------------------------------------------------------------------
def reshape_by_heads(qkv, head_num):
    B, N, _ = qkv.shape
    return qkv.reshape(B, N, head_num, -1).transpose(0, 2, 1, 3)


def set_kv(encoded_nodes, wk, wv, w_combine):
    # TODO(synk): optionally cast k_t / v_comb / single_head_key to bf16 on v6e/v7x
    # (keep softmax/exp/tanh math in f32) for ~4x MXU throughput and half the VMEM.
    k = reshape_by_heads(encoded_nodes @ wk, HEAD)             # (B, H, G, QKV)
    v = reshape_by_heads(encoded_nodes @ wv, HEAD)             # (B, H, G, QKV)
    k_t = jnp.transpose(k, (0, 1, 3, 2))                       # (B, H, QKV, G) lane-dense G
    wc_heads = w_combine.reshape(HEAD, QKV, EMB)               # per-head combine block
    v_comb = jnp.einsum('bhgd,hde->bhge', v, wc_heads)         # combine folded into v
    single_head_key = jnp.transpose(encoded_nodes, (0, 2, 1))  # (B, EMB, G)
    return k_t, v_comb, single_head_key


def set_q1(encoded_q1, wq_first):
    return reshape_by_heads(encoded_q1 @ wq_first, HEAD)       # (B, H, POMO, QKV)


# ---------------------------------------------------------------------------
# Pure-JAX reference of the PyTorch forward (for verification).
# ---------------------------------------------------------------------------
def ref_forward(encoded_last_node, ninf_mask, encoded_q1, encoded_nodes,
                wq_first, wq_last, wk, wv, w_combine, b_combine):
    B, POMO, _ = encoded_last_node.shape
    k = reshape_by_heads(encoded_nodes @ wk, HEAD)
    v = reshape_by_heads(encoded_nodes @ wv, HEAD)
    shk = jnp.transpose(encoded_nodes, (0, 2, 1))
    q_first = reshape_by_heads(encoded_q1 @ wq_first, HEAD)
    q_last = reshape_by_heads(encoded_last_node @ wq_last, HEAD)
    q = q_first + q_last
    s = jnp.einsum('bhpd,bhgd->bhpg', q, k) / math.sqrt(QKV)
    s = s + ninf_mask[:, None, :, :]
    w = jax.nn.softmax(s, axis=-1)
    out = jnp.einsum('bhpg,bhgd->bhpd', w, v)
    out_concat = out.transpose(0, 2, 1, 3).reshape(B, POMO, HEAD * QKV)
    mh = out_concat @ w_combine + b_combine
    score = jnp.einsum('bpe,beg->bpg', mh, shk)
    score = LOGIT_CLIP * jnp.tanh(score / SQRT_EMB) + ninf_mask
    return jax.nn.softmax(score, axis=-1)


if __name__ == "__main__":
    B, POMO, G = 2, 8, 16  # batch, pomo rollouts, problem/graph size (small test shapes)

    key = jax.random.PRNGKey(0)
    keys = jax.random.split(key, 10)

    # Deterministic synthetic parameters (Linear weights stored as (in, out)).
    wscale = 1.0 / math.sqrt(EMB)
    wq_first = jax.random.normal(keys[0], (EMB, HEAD * QKV), jnp.float32) * wscale
    wq_last = jax.random.normal(keys[1], (EMB, HEAD * QKV), jnp.float32) * wscale
    wk = jax.random.normal(keys[2], (EMB, HEAD * QKV), jnp.float32) * wscale
    wv = jax.random.normal(keys[3], (EMB, HEAD * QKV), jnp.float32) * wscale
    w_combine = jax.random.normal(keys[4], (HEAD * QKV, EMB), jnp.float32) * wscale
    b_combine = jax.random.normal(keys[5], (EMB,), jnp.float32) * 0.01

    # Synthetic activations.
    encoded_nodes = jax.random.normal(keys[6], (B, G, EMB), jnp.float32)       # encoder output
    encoded_q1 = jax.random.normal(keys[7], (B, POMO, EMB), jnp.float32)       # first-node embeds
    encoded_last_node = jax.random.normal(keys[8], (B, POMO, EMB), jnp.float32)

    # ninf mask: a few visited nodes per row get -inf, but never the whole row.
    mask_bits = jax.random.bernoulli(keys[9], p=0.25, shape=(B, POMO, G))
    mask_bits = mask_bits.at[:, :, 0].set(False)   # guarantee at least one feasible node
    ninf_mask = jnp.where(mask_bits, -jnp.inf, 0.0).astype(jnp.float32)

    # "set_kv" / "set_q1" state (plain JAX glue, amortized across decode steps).
    k_t, v_comb, single_head_key = set_kv(encoded_nodes, wk, wv, w_combine)
    q_first = set_q1(encoded_q1, wq_first)

    probs = pomo_decoder_forward(encoded_last_node, ninf_mask, q_first, k_t, v_comb,
                                 single_head_key, wq_last, b_combine)
    probs = jax.block_until_ready(probs)

    ref = ref_forward(encoded_last_node, ninf_mask, encoded_q1, encoded_nodes,
                      wq_first, wq_last, wk, wv, w_combine, b_combine)

    assert probs.shape == (B, POMO, G)
    # Tolerances relaxed slightly to account for pl.reciprocal(approx=True) normalization.
    assert jnp.allclose(jnp.sum(probs, axis=-1), 1.0, atol=1e-2)
    assert jnp.allclose(probs, ref, atol=1e-2, rtol=1e-2)

    print("KERNEL_OK")
</pallas_src>

<mosaic_0001>
module attributes {stable_mosaic.version = 11 : i64} {
  func.func @_decoder_kernel(%arg0: i32, %arg1: i32, %arg2: memref<1x8x8x16xf32, #tpu.memory_space<vmem>>, %arg3: memref<1x8x16x128xf32, #tpu.memory_space<vmem>>, %arg4: memref<1x8x128x128xf32, #tpu.memory_space<vmem>>, %arg5: memref<1x128x128xf32, #tpu.memory_space<vmem>>, %arg6: memref<1x8x128xf32, #tpu.memory_space<vmem>>, %arg7: memref<1x128xf32, #tpu.memory_space<vmem>>, %arg8: memref<1x8x128xf32, #tpu.memory_space<vmem>>) attributes {dimension_semantics = [#tpu.dimension_semantics<parallel>, #tpu.dimension_semantics<parallel>], iteration_bounds = array<i64: 2, 1>, scalar_prefetch = 0 : i64, scratch_operands = 0 : i64, tpu.core_type = #tpu.core_type<tc>, window_params = [{transform_indices = @transform_0, window_bounds = array<i64: 1, 8, 8, 16>}, {transform_indices = @transform_1, window_bounds = array<i64: 1, 8, 16, 128>}, {transform_indices = @transform_2, window_bounds = array<i64: 1, 8, 128, 128>}, {transform_indices = @transform_3, window_bounds = array<i64: 1, 128, 128>}, {transform_indices = @transform_4, window_bounds = array<i64: 1, 8, 128>}, {pipeline_mode = #tpu.pipeline_mode<synchronous>, transform_indices = @transform_5, window_bounds = array<i64: 1, 128>}, {transform_indices = @transform_6, window_bounds = array<i64: 1, 8, 128>}]} {
    %c0 = arith.constant 0 : index
    %c0_0 = arith.constant 0 : index
    %c0_1 = arith.constant 0 : index
    %0 = vector.load %arg6[%c0, %c0_0, %c0_1] : memref<1x8x128xf32, #tpu.memory_space<vmem>>, vector<1x8x128xf32>
    %1 = vector.shape_cast %0 : vector<1x8x128xf32> to vector<8x128xf32>
    %c0_2 = arith.constant 0 : index
    %c0_3 = arith.constant 0 : index
    %c0_4 = arith.constant 0 : index
    %c0_5 = arith.constant 0 : index
    %2 = vector.load %arg2[%c0_2, %c0_3, %c0_4, %c0_5] : memref<1x8x8x16xf32, #tpu.memory_space<vmem>>, vector<1x8x8x16xf32>
    %3 = vector.shape_cast %2 : vector<1x8x8x16xf32> to vector<8x8x16xf32>
    %c0_6 = arith.constant 0 : index
    %c0_7 = arith.constant 0 : index
    %c0_8 = arith.constant 0 : index
    %c0_9 = arith.constant 0 : index
    %4 = vector.load %arg3[%c0_6, %c0_7, %c0_8, %c0_9] : memref<1x8x16x128xf32, #tpu.memory_space<vmem>>, vector<1x8x16x128xf32>
    %5 = vector.shape_cast %4 : vector<1x8x16x128xf32> to vector<8x16x128xf32>
    "tpu.trace_start"() <{level = 10 : i32, message = "hpd,hdg->hpg"}> : () -> ()
    %cst = arith.constant dense<0.000000e+00> : vector<8x8x128xf32>
    %6 = tpu.matmul %3, %5, %cst {dimension_numbers = #tpu.dot_dimension_numbers<[2], [1], [1], [2], [0, 0, 0, 1, 1, 2], [0], [0]>} : vector<8x8x16xf32>, vector<8x16x128xf32>, vector<8x8x128xf32> -> vector<8x8x128xf32>
    "tpu.trace_stop"() : () -> ()
    %cst_10 = arith.constant 2.500000e-01 : f32
    %7 = vector.broadcast %cst_10 : f32 to vector<8x8x128xf32>
    %8 = arith.mulf %6, %7 : vector<8x8x128xf32>
    %9 = vector.shape_cast %1 : vector<8x128xf32> to vector<1x8x128xf32>
    %10 = vector.broadcast %9 : vector<1x8x128xf32> to vector<8x8x128xf32>
    %11 = arith.addf %8, %10 : vector<8x8x128xf32>
    %cst_11 = arith.constant dense<0xFF800000> : vector<8x8xf32>
    %12 = vector.multi_reduction <maximumf>, %11, %cst_11 [2] : vector<8x8x128xf32> to vector<8x8xf32>
    %13 = vector.shape_cast %12 : vector<8x8xf32> to vector<8x8x1xf32>
    %14 = vector.broadcast %13 : vector<8x8x1xf32> to vector<8x8x128xf32>
    %15 = arith.subf %11, %14 : vector<8x8x128xf32>
    %16 = math.exp %15 : vector<8x8x128xf32>
    %cst_12 = arith.constant dense<0.000000e+00> : vector<8x8xf32>
    %17 = vector.multi_reduction <add>, %16, %cst_12 [2] : vector<8x8x128xf32> to vector<8x8xf32>
    %18 = vector.shape_cast %17 : vector<8x8xf32> to vector<8x8x1xf32>
    %19 = tpu.reciprocal %18 {approx = true} : vector<8x8x1xf32> -> vector<8x8x1xf32>
    %20 = vector.broadcast %19 : vector<8x8x1xf32> to vector<8x8x128xf32>
    %21 = arith.mulf %16, %20 : vector<8x8x128xf32>
    %c0_13 = arith.constant 0 : index
    %c0_14 = arith.constant 0 : index
    %c0_15 = arith.constant 0 : index
    %c0_16 = arith.constant 0 : index
    %22 = vector.load %arg4[%c0_13, %c0_14, %c0_15, %c0_16] : memref<1x8x128x128xf32, #tpu.memory_space<vmem>>, vector<1x8x128x128xf32>
    %23 = vector.shape_cast %22 : vector<1x8x128x128xf32> to vector<8x128x128xf32>
    "tpu.trace_start"() <{level = 10 : i32, message = "hpg,hge->hpe"}> : () -> ()
    %cst_17 = arith.constant dense<0.000000e+00> : vector<8x8x128xf32>
    %24 = tpu.matmul %21, %23, %cst_17 {dimension_numbers = #tpu.dot_dimension_numbers<[2], [1], [1], [2], [0, 0, 0, 1, 1, 2], [0], [0]>} : vector<8x8x128xf32>, vector<8x128x128xf32>, vector<8x8x128xf32> -> vector<8x8x128xf32>
    "tpu.trace_stop"() : () -> ()
    %cst_18 = arith.constant dense<0.000000e+00> : vector<8x128xf32>
    %25 = vector.multi_reduction <add>, %24, %cst_18 [0] : vector<8x8x128xf32> to vector<8x128xf32>
    %c0_19 = arith.constant 0 : index
    %c0_20 = arith.constant 0 : index
    %26 = vector.load %arg7[%c0_19, %c0_20] : memref<1x128xf32, #tpu.memory_space<vmem>>, vector<1x128xf32>
    %27 = vector.broadcast %26 : vector<1x128xf32> to vector<8x128xf32>
    %28 = arith.addf %25, %27 : vector<8x128xf32>
    %c0_21 = arith.constant 0 : index
    %c0_22 = arith.constant 0 : index
    %c0_23 = arith.constant 0 : index
    %29 = vector.load %arg5[%c0_21, %c0_22, %c0_23] : memref<1x128x128xf32, #tpu.memory_space<vmem>>, vector<1x128x128xf32>
    %30 = vector.shape_cast %29 : vector<1x128x128xf32> to vector<128x128xf32>
    %cst_24 = arith.constant dense<0.000000e+00> : vector<8x128xf32>
    %31 = tpu.matmul %28, %30, %cst_24 {dimension_numbers = #tpu.dot_dimension_numbers<[1], [0], [0], [1], [0, 0, 1, 1], [], []>} : vector<8x128xf32>, vector<128x128xf32>, vector<8x128xf32> -> vector<8x128xf32>
    %cst_25 = arith.constant 0.0883883461 : f32
    %32 = vector.broadcast %cst_25 : f32 to vector<8x128xf32>
    %33 = arith.mulf %31, %32 : vector<8x128xf32>
    %34 = math.tanh %33 : vector<8x128xf32>
    %cst_26 = arith.constant 1.000000e+01 : f32
    %35 = vector.broadcast %cst_26 : f32 to vector<8x128xf32>
    %36 = arith.mulf %35, %34 : vector<8x128xf32>
    %37 = arith.addf %36, %1 : vector<8x128xf32>
    %38 = math.exp %37 : vector<8x128xf32>
    %cst_27 = arith.constant dense<0.000000e+00> : vector<8xf32>
    %39 = vector.multi_reduction <add>, %38, %cst_27 [1] : vector<8x128xf32> to vector<8xf32>
    %40 = vector.shape_cast %39 : vector<8xf32> to vector<8x1xf32>
    %41 = tpu.reciprocal %40 {approx = true} : vector<8x1xf32> -> vector<8x1xf32>
    %42 = vector.broadcast %41 : vector<8x1xf32> to vector<8x128xf32>
    %43 = arith.mulf %38, %42 : vector<8x128xf32>
    %c0_28 = arith.constant 0 : index
    %c0_29 = arith.constant 0 : index
    %c0_30 = arith.constant 0 : index
    %44 = vector.load %arg8[%c0_28, %c0_29, %c0_30] : memref<1x8x128xf32, #tpu.memory_space<vmem>>, vector<1x8x128xf32>
    %45 = vector.shape_cast %44 : vector<1x8x128xf32> to vector<8x128xf32>
    %46 = vector.shape_cast %43 : vector<8x128xf32> to vector<1x8x128xf32>
    tpu.vector_store %arg8[%c0_28, %c0_29, %c0_30], %46 {strides = array<i32>} : memref<1x8x128xf32, #tpu.memory_space<vmem>>, vector<1x8x128xf32>,
    return
  }
  func.func @transform_0(%arg0: i32, %arg1: i32) -> (i32, i32, i32, i32) {
    %c0_i32 = arith.constant 0 : i32
    %c0_i32_0 = arith.constant 0 : i32
    %c0_i32_1 = arith.constant 0 : i32
    return %arg0, %c0_i32, %arg1, %c0_i32_0 : i32, i32, i32, i32
  }
  func.func @transform_1(%arg0: i32, %arg1: i32) -> (i32, i32, i32, i32) {
    %c0_i32 = arith.constant 0 : i32
    %c0_i32_0 = arith.constant 0 : i32
    %c0_i32_1 = arith.constant 0 : i32
    %c0_i32_2 = arith.constant 0 : i32
    return %arg0, %c0_i32, %c0_i32_0, %c0_i32_1 : i32, i32, i32, i32
  }
  func.func @transform_2(%arg0: i32, %arg1: i32) -> (i32, i32, i32, i32) {
    %c0_i32 = arith.constant 0 : i32
    %c0_i32_0 = arith.constant 0 : i32
    %c0_i32_1 = arith.constant 0 : i32
    %c0_i32_2 = arith.constant 0 : i32
    return %arg0, %c0_i32, %c0_i32_0, %c0_i32_1 : i32, i32, i32, i32
  }
  func.func @transform_3(%arg0: i32, %arg1: i32) -> (i32, i32, i32) {
    %c0_i32 = arith.constant 0 : i32
    %c0_i32_0 = arith.constant 0 : i32
    %c0_i32_1 = arith.constant 0 : i32
    return %arg0, %c0_i32, %c0_i32_0 : i32, i32, i32
  }
  func.func @transform_4(%arg0: i32, %arg1: i32) -> (i32, i32, i32) {
    %c0_i32 = arith.constant 0 : i32
    %c0_i32_0 = arith.constant 0 : i32
    return %arg0, %arg1, %c0_i32 : i32, i32, i32
  }
  func.func @transform_5(%arg0: i32, %arg1: i32) -> (i32, i32) {
    %c0_i32 = arith.constant 0 : i32
    %c0_i32_0 = arith.constant 0 : i32
    %c0_i32_1 = arith.constant 0 : i32
    return %c0_i32, %c0_i32_0 : i32, i32
  }
  func.func @transform_6(%arg0: i32, %arg1: i32) -> (i32, i32, i32) {
    %c0_i32 = arith.constant 0 : i32
    %c0_i32_0 = arith.constant 0 : i32
    return %arg0, %arg1, %c0_i32 : i32, i32, i32
  }
}

</mosaic_0001>

<bundles_post_ra>
// kernel: tpu_custom_call.1
= control target key start
LH: loop header
LB: loop body
LE: loop exit
PB: predicated region body
PF: predicated region fallthrough
CT: control target
= control target key end

     0   :  { %s2173_s0 = inlined_call_operand.hbm [shape: f32[2,8,8,16], index: 0, kind: input, shape index: {}]   ;;  %s2174_s1 = inlined_call_operand.hbm [shape: f32[2,8,16,128], index: 1, kind: input, shape index: {}]   ;;  %s2175_s2 = inlined_call_operand.hbm [shape: f32[2,8,128,128], index: 2, kind: input, shape index: {}]   ;;  %s2176_s3 = inlined_call_operand.hbm [shape: f32[2,128,128], index: 3, kind: input, shape index: {}]   ;;  %s2177_s4 = inlined_call_operand.hbm [shape: f32[2,8,128], index: 4, kind: input, shape index: {}]   ;;  %s2178_s5 = inlined_call_operand.vmem [shape: f32[1,128], index: 5, kind: input, shape index: {}]   ;;  %s2179_s6 = inlined_call_operand.hbm [shape: f32[2,8,128], index: 6, kind: output, shape index: {}]  }
   0x1   :  { %2186 = sst [smem:[#allocation22_spill]] %s2173_s0 }
   0x2   :  { %2187 = sst [smem:[#allocation23_spill]] %s2174_s1 }
   0x3   :  { %2188 = sst [smem:[#allocation24_spill]] %s2176_s3 }
   0x4   :  { %11 = vsyncpa [#allocation3], 0 }
   0x5   :  { %13 = vsyncpa [#allocation3 + $0x1], 0 }
   0x6   :  { %14 = vsyncpa [#allocation6], 0 }
   0x7   :  { %16 = vsyncpa [#allocation6 + $0x1], 0 }
   0x8   :  { %17 = vsyncpa [#allocation9], 0 }
   0x9   :  { %19 = vsyncpa [#allocation9 + $0x1], 0 }
   0xa   :  { %20 = vsyncpa [#allocation4], 0 }
   0xb   :  { %22 = vsyncpa [#allocation4 + $0x1], 0  ;;  %s1724_s21 = smov 0   ;;  %s1726_s22 = smov 0  }
   0xc   :  { %s1728_s23 = smov 0   ;;  %s1730_s24 = smov 0  }
   0xd   :  { %s1732_s25 = smov 0   ;;  %s1734_s26 = smov 0  }
   0xe LB: > { %2189 = sst [smem:[#allocation16_spill]] %s1665_s21  ;;  %s1755_s27 = sadd.s32 4294967295, %s1685_s26   ;;  %s1685_s26 = sphi %s1734_s26, %s28_s26   ;;  %s1681_s25 = sphi %s1732_s25, %s2213_s25   ;;  %s1677_s24 = sphi %s1730_s24, %s2212_s24   ;;  %s1673_s23 = sphi %s1728_s23, %s2208_s23   ;;  %s1669_s22 = sphi %s1726_s22, %s2211_s22   ;;  %s1665_s21 = sphi %s1724_s21, %s2210_s21  }
   0xf   : > { %2190 = sst [smem:[#allocation17_spill]] %s1673_s23  ;;  %s1282_s28 = sadd.s32 4294967294, %s1685_s26  }
  0x10   : > { %2191 = sst [smem:[#allocation18_spill]] %s1685_s26  ;;  %s40_s29 = sadd.s32 1, %s1681_s25 }
  0x11   : > { %s49_s30 = sadd.s32 1, %s1673_s23  ;;  %p42_p0 = scmp.ge.s32.totalorder %s40_s29, 2 }
  0x12   : > { %p56_p1 = scmp.ne.s32.totalorder %s1673_s23, %s1669_s22  ;;  %p57_p2 = scmp.eq.s32.totalorder %s1685_s26, 0 }
  0x13   : > { %p62_p3 = scmp.ne.s32.totalorder %s1669_s22, %s1665_s21  ;;  %s2215_s29 = smov (%p42_p0, %s40_s29), 0 }
  0x14   : > { %2192 = sst [smem:[#allocation19_spill]] %s2215_s29  ;;  %p1767_p4 = por %p57_p2, %p56_p1 }
  0x15   : > { %p63_p5 = scmp.eq.s32.totalorder %s1755_s27, 0  ;;  %s44_s8 = ssub.s32 %s1681_s25, %s2215_s29 }
  0x16   : > { %p215_p6 = scmp.eq.s32.totalorder %s1755_s27, 1  ;;  %p47_p7 = scmp.eq.s32.totalorder %s44_s8, 0 }
  0x17   : > { %p1775_p8 = por %p63_p5, %p62_p3  ;;  %p221_p10 = scmp.eq.s32.totalorder %s1282_s28, 1 }
  0x18   : > { %p1779_p9 = por %p215_p6, %p56_p1  ;;  %p1284_p12 = scmp.ge.s32.totalorder %s1685_s26, 2 }
  0x19   : > { %s1784_s11 = scalar_select %p47_p7, %s1673_s23, %s49_s30  }
  0x1a   : > { %p1786_p11 = por %p221_p10, %p62_p3  ;;  %p1354_p13 = scmp.lt.s32.totalorder %s1685_s26, 2 }
  0x1b   : > { %2196 = sst [smem:[#allocation20_spill]] %s1784_s11  ;;  %s1793_s13 = sand.u32 1, %s1673_s23  }
  0x1c   : > { %s2197_s12 = scalar_select %p1786_p11, 1, 0 }
  0x1d   : > { %p1797_p0 = pnand %p1354_p13, %p1767_p4  ;;  %s267_s15 = sand.u32 1, %s1685_s26  }
  0x1e   : > { %2198 = sst [smem:[#allocation21_spill]] %s2197_s12  ;;  %s1288_s16 = sshll.u32 %s1793_s13, 7 }
  0x1f   : > { %s1319_s17 = sshll.u32 %s1681_s25, 7  ;;  %s271_s18 = scalar_lea.vmem [#allocation5], %s1288_s16 }
  0x20   : > { %s279_s19 = sshll.u32 %s271_s18, 4  ;;  %s2200_s1 = sld [smem:[#allocation23_spill]]  ;;  %s280_s19 = int_to_ptr.vmem [resolvable:$true] %s279_s19 }
  0x21   : > { %p1299_p1 = scmp.ge.s32.totalorder %s1685_s26, 1  ;;  %p351_p2 = scmp.lt.s32.totalorder %s1685_s26, 3 }
  0x22   : > { %s1809_s7 = scalar_lea.sflag [#allocation6], %s267_s15  ;;  %s1687_s29 = smov 128  }
  0x23   : > { %s1688_s11 = smov 8   ;;  %p1817_p3 = pnand %p1299_p1, %p351_p2 }
  0x24   : > { %s2202_s3 = sld [smem:[#allocation24_spill]]  ;;  %s315_s23 = scalar_lea.vmem [#allocation8], %s1288_s16 }
  0x25   : > { %s323_s26 = sshll.u32 %s315_s23, 4  ;;  %s1824_s12 = scalar_lea.sflag [#allocation9], %s267_s15  ;;  %s324_s26 = int_to_ptr.vmem [resolvable:$true] %s323_s26 }
  0x26   : > { %s276_s30 = scalar_lea.hbm %s2200_s1, %s1319_s17  ;;  %s2203_s0 = sld [smem:[#allocation22_spill]] }
  0x27   : > { %s277_s8 = sshll.u32 %s276_s30, 4  ;;  %s278_s8 = int_to_ptr.hbm [resolvable:$true] %s277_s8 }
  0x28   : > { %1340 = dma.hbm_to_vmem [thread:$0]  (!%p1797_p0), %s278_s8, 2048, %s280_s19, %s1809_s7, %s1687_s29, %s1687_s29, %s1688_s11  }
  0x29   : > { %s1285_s19 = sshll.u32 %s1793_s13, 6  ;;  %s1318_s8 = sshll.u32 %s1681_s25, 6 }
  0x2a   : > { %s320_s30 = scalar_lea.hbm %s2202_s3, %s1319_s17  ;;  %s248_s16 = scalar_lea.vmem [#allocation2], %s1285_s19 }
  0x2b   : > { %s321_s1 = sshll.u32 %s320_s30, 4  ;;  %s257_s23 = sshll.u32 %s248_s16, 4  ;;  %s322_s1 = int_to_ptr.hbm [resolvable:$true] %s321_s1  ;;  %s258_s23 = int_to_ptr.vmem [resolvable:$true] %s257_s23 }
  0x2c   : > { %1346 = dma.hbm_to_vmem [thread:$0]  (!%p1797_p0), %s322_s1, 2048, %s324_s26, %s1824_s12, %s1687_s29, %s1687_s29, %s1688_s11  }
  0x2d   : > { %s254_s28 = scalar_lea.hbm %s2203_s0, %s1318_s8  ;;  %s1291_s30 = sshll.u32 %s1793_s13, 10 }
  0x2e   : > { %s255_s15 = sshll.u32 %s254_s28, 4  ;;  %s245_s3 = scalar_lea.sflag [#allocation3], %s1793_s13  ;;  %s256_s15 = int_to_ptr.hbm [resolvable:$true] %s255_s15 }
  0x2f   : > { %1337 = dma.hbm_to_vmem [thread:$0]  (!%p1797_p0), %s256_s15, 1024, %s258_s23, %s245_s3, %s1687_s29, %s1687_s29, %s1688_s11  }
  0x30   : > { %s1320_s1 = sshll.u32 %s1681_s25, 10  ;;  %s293_s8 = scalar_lea.vmem [#allocation7], %s1291_s30 }
  0x31   : > { %s298_s19 = scalar_lea.hbm %s2175_s2, %s1320_s1  ;;  %s301_s20 = sshll.u32 %s293_s8, 4  ;;  %s302_s20 = int_to_ptr.vmem [resolvable:$true] %s301_s20 }
  0x32   : > { %s299_s16 = sshll.u32 %s298_s19, 4  ;;  %s1297_s28 = sshll.u32 %s1793_s13, 3  ;;  %s300_s16 = int_to_ptr.hbm [resolvable:$true] %s299_s16 }
  0x33   : > { %1343 = dma.hbm_to_vmem [thread:$0]  (!%p1797_p0), %s300_s16, 16384, %s302_s20, %s1809_s7, %s1687_s29, %s1687_s29, %s1688_s11  }
  0x34   : > { %s1298_s0 = sshll.u32 %s1681_s25, 3  ;;  %s337_s26 = scalar_lea.vmem [#allocation10], %s1297_s28 }
  0x35   : > { %s342_s15 = scalar_lea.hbm %s2177_s4, %s1298_s0  ;;  %s346_s17 = sshll.u32 %s337_s26, 4  ;;  %s347_s17 = int_to_ptr.vmem [resolvable:$true] %s346_s17 }
  0x36   : > { %s344_s21 = sshll.u32 %s342_s15, 4  ;;  %355 = sbr.rel (%p1817_p3) target bundleno = 894 (0x37e), region = 44  ;;  %s345_s21 = int_to_ptr.hbm [resolvable:$true] %s344_s21 }
  0x37   : > { %1349 = dma.hbm_to_vmem [thread:$0]  (!%p1797_p0), %s345_s21, 128, %s347_s17, %s1824_s12  }
  0x38   : > { %s1865_s13 = sand.u32 (!%p1817_p3), 1, %s1669_s22  }
  0x39   : > { %s1300_s29 = sshll.u32 (!%p1817_p3), %s1865_s13, 6  ;;  %s358_s11 = scalar_lea.sflag (!%p1817_p3), [#allocation3], %s1865_s13 }
  0x3a   : > { %s1869_s7 = scalar_lea.vmem (!%p1817_p3), [#allocation2], %s1300_s29 }
  0x3b   : > { %1648 = dma.done.wait (%p1775_p8), %s358_s11, 1024  }
  0x3c   : > { %1650 = vsyncadd (%p1775_p8), %s358_s11, 4294966272  ;;  %s367_s0 = sand.u32 1, %s1755_s27   ;;  %s1301_s21 = sshll.u32 %s1865_s13, 7 }
  0x3d   : > { %s368_s12 = scalar_lea.sflag [#allocation6], %s367_s0  ;;  %s1877_s14 = scalar_lea.vmem [#allocation5], %s1301_s21 }
  0x3e   : > { %1652 = dma.done.wait (%p1775_p8), %s368_s12, 18432  }
  0x3f   : > { %1654 = vsyncadd (%p1775_p8), %s368_s12, 4294948864  ;;  %s1302_s18 = sshll.u32 %s1865_s13, 10  ;;  %s388_s1 = scalar_lea.sflag [#allocation9], %s367_s0 }
  0x40   : > { %s1884_s30 = scalar_lea.vmem [#allocation7], %s1302_s18  ;;  %s1886_s19 = scalar_lea.vmem [#allocation8], %s1301_s21 }
  0x41   : > { %1656 = dma.done.wait (%p1775_p8), %s388_s1, 2176  }
  0x42   : > { %1658 = vsyncadd (%p1775_p8), %s388_s1, 4294965120  ;;  %v465_v0 = vld [vmem:[%s1877_s14 + $0x28] sm:$0xff]  ;;  %v467_v1 = vld [vmem:[%s1877_s14 + $0x38] sm:$0xff]  ;;  %vm476_vm0 = vcmask 130048   ;;  %s1304_s27 = sshll.u32 %s1865_s13, 3  ;;  %s1315_s16 = sshll.u32 %s1677_s24, 3 }
  0x43   : > { %v464_v2 = vld [vmem:[%s1877_s14 + $0x20] sm:$0xff]  ;;  %540 = vmatpush.msra.mxu2 %v465_v0  ;;  %563 = vmatpush.msra.mxu3 %v467_v1  ;;  %v466_v3 = vld [vmem:[%s1877_s14 + $0x30] sm:$0xff]  ;;  %v455_v5 = vld [vmem:[%s1869_s7 + $0x18] sm:$0xff]  ;;  %s401_s9 = scalar_lea.vmem [#allocation10], %s1304_s27  ;;  %s1108_s23 = scalar_lea.hbm %s2179_s6, %s1315_s16 }
  0x44   : > { %v454_v4 = vld [vmem:[%s1869_s7 + $0x10] sm:$0xff]  ;;  %v469_v6 = vld [vmem:[%s1877_s14 + $0x48] sm:$0xff]  ;;  %v468_v8 = vld [vmem:[%s1877_s14 + $0x40] sm:$0xff]  ;;  %s450_s15 = scalar_lea.vmem [#allocation11], %s1304_s27  ;;  %s1112_s17 = sshll.u32 %s1108_s23, 4  ;;  %s1113_s17 = int_to_ptr.hbm [resolvable:$true] %s1112_s17 }
  0x45   : > { %v461_v7 = vld [vmem:[%s1877_s14 + $0x8] sm:$0xff]  ;;  %541 = vmatpush.msra.mxu2 %v464_v2  ;;  %564 = vmatpush.msra.mxu3 %v466_v3  ;;  %v460_v9 = vld [vmem:[%s1877_s14] sm:$0xff]  ;;  %v475_v12 = vld [vmem:[%s1877_s14 + $0x78] sm:$0xff]  ;;  %s1110_s26 = sshll.u32 %s450_s15, 4  ;;  %s1097_s29 = scalar_lea.sflag [#allocation4], %s1865_s13  ;;  %s1111_s26 = int_to_ptr.vmem [resolvable:$true] %s1110_s26 }
  0x46   : > { %1308 = vmatmul.msk.f32.vlgmr.msra.gmra.mxu2 %vm476_vm0, %v454_v4  ;;  %1309 = vmatmul.msk.f32.vlgmr.msra.gmra.mxu3 %vm476_vm0, %v455_v5  ;;  %v452_v10 = vld [vmem:[%s1869_s7] sm:$0xff]  ;;  %v473_v11 = vld [vmem:[%s1877_s14 + $0x68] sm:$0xff]  ;;  %v463_v13 = vld [vmem:[%s1877_s14 + $0x18] sm:$0xff]  ;;  %s1609_s11 = sshra.s32 %s1113_s17, 4  ;;  %s1615_s21 = scalar_lea.hbm %s2179_s6, 16  ;;  %s1610_s11 = int_to_ptr.hbm [resolvable:$true] %s1609_s11 }
  0x47   : > { %586 = vmatpush.msrb.mxu2 %v469_v6  ;;  %494 = vmatpush.msra.mxu1 %v461_v7  ;;  %v474_v14 = vld [vmem:[%s1877_s14 + $0x70] sm:$0xff]  ;;  %v472_v15 = vld [vmem:[%s1877_s14 + $0x60] sm:$0xff]  ;;  %v459_v18 = vld [vmem:[%s1869_s7 + $0x38] sm:$0xff]  ;;  %s1611_s24 = scalar_lea.hbm %s1610_s11, 8  ;;  %p1616_p7 = scmp.lt.s32.totalorder %s1610_s11, %s2179_s6 }
  0x48   : > { %655 = vmatpush.msrb.mxu3 %v475_v12  ;;  %v462_v16 = vld [vmem:[%s1877_s14 + $0x10] sm:$0xff]  ;;  %v456_v17 = vld [vmem:[%s1869_s7 + $0x20] sm:$0xff]  ;;  %v471_v19 = vld [vmem:[%s1877_s14 + $0x58] sm:$0xff]  ;;  %p1612_p4 = scmp.ne.s32.totalorder %s1610_s11, %s1611_s24  ;;  %p1617_p8 = scmp.lt.s32.totalorder %s1615_s21, %s1611_s24 }
  0x49   : > { %587 = vmatpush.msrb.mxu2 %v468_v8  ;;  %495 = vmatpush.msra.mxu1 %v460_v9  ;;  %v470_v20 = vld [vmem:[%s1877_s14 + $0x50] sm:$0xff]  ;;  %v453_v21 = vld [vmem:[%s1869_s7 + $0x8] sm:$0xff]  ;;  %v796_v55 = vld [vmem:[%s1884_s30 + $0x178] sm:$0xff] }
  0x4a   : > { %1306 = vmatmul.msk.f32.vlgmr.msra.gmra.mxu1 %vm476_vm0, %v452_v10  ;;  %656 = vmatpush.msrb.mxu3 %v474_v14  ;;  %v458_v22 = vld [vmem:[%s1869_s7 + $0x30] sm:$0xff]  ;;  %v457_v23 = vld [vmem:[%s1869_s7 + $0x28] sm:$0xff]  ;;  %v812_v56 = vld [vmem:[%s1884_s30 + $0x1f8] sm:$0xff]  ;;  %p1613_p5 = pnand %p1612_p4, %p1779_p9  ;;  %p1618_p10 = por %p1617_p8, %p1616_p7 }
  0x4b   : > { %632 = vmatpush.msra.mxu2 %v473_v11  ;;  %517 = vmatpush.msrb.mxu1 %v463_v13  ;;  %v1927_v27 = vld [vmem:[%s401_s9] sm:$0xff]  ;;  %v795_v57 = vld [vmem:[%s1884_s30 + $0x170] sm:$0xff]  ;;  %v764_v61 = vld [vmem:[%s1884_s30 + $0x78] sm:$0xff] }
  0x4c   : > { %937 = vmatpush.msra.mxu3 %v812_v56  ;;  %v811_v58 = vld [vmem:[%s1884_s30 + $0x1f0] sm:$0xff]  ;;  %v794_v59 = vld [vmem:[%s1884_s30 + $0x168] sm:$0xff]  ;;  %v780_v0 = vld [vmem:[%s1884_s30 + $0xf8] sm:$0xff]  ;;  %877 = vmatpush.msra.mxu0 %v764_v61  ;;  %p1614_p6 = pneg %p1613_p5 }
  0x4d   : > { %633 = vmatpush.msra.mxu2 %v472_v15  ;;  %518 = vmatpush.msrb.mxu1 %v462_v16  ;;  %v810_v60 = vld [vmem:[%s1884_s30 + $0x1e8] sm:$0xff]  ;;  %v793_v3 = vld [vmem:[%s1884_s30 + $0x160] sm:$0xff]  ;;  %v763_v4 = vld [vmem:[%s1884_s30 + $0x70] sm:$0xff] }
  0x4e   : > { %1310 = vmatmul.msk.f32.vlgmr.msrb.gmra.mxu2 %vm476_vm0, %v456_v17  ;;  %1313 = vmatmul.msk.f32.vlgmr.msrb.gmra.mxu3 %vm476_vm0, %v459_v18  ;;  %v779_v5 = vld [vmem:[%s1884_s30 + $0xf0] sm:$0xff]  ;;  %v809_v6 = vld [vmem:[%s1884_s30 + $0x1e0] sm:$0xff]  ;;  %v792_v10 = vld [vmem:[%s1884_s30 + $0x158] sm:$0xff]  ;;  %p1619_p13 = pnand %p1618_p10, %p1614_p6 }
  0x4f   : > { %609 = vmatpush.msra.mxu1 %v471_v19  ;;  %917 = vmatpush.msrb.mxu2 %v796_v55  ;;  %v762_v11 = vld [vmem:[%s1884_s30 + $0x68] sm:$0xff]  ;;  %v808_v13 = vld [vmem:[%s1884_s30 + $0x1d8] sm:$0xff]  ;;  %v791_v15 = vld [vmem:[%s1884_s30 + $0x150] sm:$0xff] }
  0x50   : > { %938 = vmatpush.msra.mxu3 %v811_v58  ;;  %878 = vmatpush.msra.mxu0 %v763_v4  ;;  %v778_v14 = vld [vmem:[%s1884_s30 + $0xe8] sm:$0xff]  ;;  %v761_v16 = vld [vmem:[%s1884_s30 + $0x60] sm:$0xff]  ;;  %v807_v17 = vld [vmem:[%s1884_s30 + $0x1d0] sm:$0xff] }
  0x51   : > { %610 = vmatpush.msra.mxu1 %v470_v20  ;;  %918 = vmatpush.msrb.mxu2 %v795_v57  ;;  %v777_v18 = vld [vmem:[%s1884_s30 + $0xe0] sm:$0xff]  ;;  %v790_v19 = vld [vmem:[%s1884_s30 + $0x148] sm:$0xff]  ;;  %v760_v20 = vld [vmem:[%s1884_s30 + $0x58] sm:$0xff] }
  0x52   : > { %1307 = vmatmul.msk.f32.vlgmr.msrb.gmra.mxu1 %vm476_vm0, %v453_v21  ;;  %939 = vmatpush.msra.mxu3 %v810_v60  ;;  %v801_v57 = vld [vmem:[%s1884_s30 + $0x1a0] sm:$0xff]  ;;  %v755_v58 = vld [vmem:[%s1884_s30 + $0x30] sm:$0xff]  ;;  %v800_v60 = vld [vmem:[%s1884_s30 + $0x198] sm:$0xff] }
  0x53   : > { %897 = vmatpush.msrb.mxu1 %v780_v0  ;;  %919 = vmatpush.msrb.mxu2 %v794_v59  ;;  %v771_v61 = vld [vmem:[%s1884_s30 + $0xb0] sm:$0xff]  ;;  %v798_v4 = vld [vmem:[%s1884_s30 + $0x188] sm:$0xff] }
  0x54   : > { %940 = vmatpush.msra.mxu3 %v809_v6  ;;  %879 = vmatpush.msra.mxu0 %v762_v11  ;;  %v799_v0 = vld [vmem:[%s1884_s30 + $0x190] sm:$0xff]  ;;  %v860_v11 = vld [vmem:[%s1884_s30 + $0x378] sm:$0xff] }
  0x55   : > { %898 = vmatpush.msrb.mxu1 %v779_v5  ;;  %920 = vmatpush.msrb.mxu2 %v793_v3  ;;  %v753_v3 = vld [vmem:[%s1884_s30 + $0x20] sm:$0xff] }
  0x56   : > { %1312 = vmatmul.msk.f32.vlgmr.msra.gmra.mxu2 %vm476_vm0, %v458_v22  ;;  %941 = vmatpush.msra.mxu3 %v808_v13  ;;  %v806_v22 = vld [vmem:[%s1884_s30 + $0x1c8] sm:$0xff]  ;;  %v769_v5 = vld [vmem:[%s1884_s30 + $0xa0] sm:$0xff]  ;;  %v876_v13 = vld [vmem:[%s1884_s30 + $0x3f8] sm:$0xff] }
  0x57   : > { %921 = vmatpush.msrb.mxu2 %v792_v10  ;;  %899 = vmatpush.msrb.mxu1 %v778_v14  ;;  %v752_v14 = vld [vmem:[%s1884_s30 + $0x18] sm:$0xff] }
  0x58   : > { %880 = vmatpush.msra.mxu0 %v761_v16  ;;  %942 = vmatpush.msra.mxu3 %v807_v17  ;;  %v859_v16 = vld [vmem:[%s1884_s30 + $0x370] sm:$0xff] }
  0x59   : > { %922 = vmatpush.msrb.mxu2 %v791_v15  ;;  %900 = vmatpush.msrb.mxu1 %v777_v18  ;;  %v768_v15 = vld [vmem:[%s1884_s30 + $0x98] sm:$0xff]  ;;  %v875_v17 = vld [vmem:[%s1884_s30 + $0x3f0] sm:$0xff] }
  0x5a   : > { %1311 = vmatmul.msk.f32.vlgmr.msra.gmra.mxu1 %vm476_vm0, %v457_v23  ;;  %v776_v23 = vld [vmem:[%s1884_s30 + $0xd8] sm:$0xff]  ;;  %881 = vmatpush.msra.mxu0 %v760_v20  ;;  %v751_v18 = vld [vmem:[%s1884_s30 + $0x10] sm:$0xff]  ;;  %v858_v20 = vld [vmem:[%s1884_s30 + $0x368] sm:$0xff] }
  0x5b   : > { %923 = vmatpush.msrb.mxu2 %v790_v19  ;;  %943 = vmatpush.msra.mxu3 %v806_v22  ;;  %v767_v19 = vld [vmem:[%s1884_s30 + $0x90] sm:$0xff]  ;;  %v750_v22 = vld [vmem:[%s1884_s30 + $0x8] sm:$0xff] }
  0x5c   : > { %901 = vmatpush.msrb.mxu1 %v776_v23  ;;  %v766_v23 = vld [vmem:[%s1884_s30 + $0x88] sm:$0xff] }
  0xc7   : > { %v497_v24 = vpop.f32.mrf.mxu1 }
  0xc8   : > { %v661_v32 = vmul.f32 0.25, %v497_v24 }
  0xc9   : > { %v543_v25 = vpop.f32.mrf.mxu2  ;;  %v566_v26 = vpop.f32.mrf.mxu3 }
  0xca   : > { %v663_v28 = vmul.f32 0.25, %v543_v25  ;;  %v664_v29 = vmul.f32 0.25, %v566_v26  ;;  %v669_v37 = vadd.f32 %v661_v32, %v1927_v27  ;;  %v789_v26 = vld [vmem:[%s1884_s30 + $0x140] sm:$0xff] }
  0xcb   : > { %924 = vmatpush.msrb.mxu2 %v789_v26  ;;  %v749_v26 = vld [vmem:[%s1884_s30] sm:$0xff] }
  0xcc   : > { %v672_v30 = vadd.f32 %v664_v29, %v1927_v27  ;;  %v671_v31 = vadd.f32 %v663_v28, %v1927_v27  ;;  %v759_v28 = vld [vmem:[%s1884_s30 + $0x50] sm:$0xff] }
  0xcd   : > { %882 = vmatpush.msra.mxu0 %v759_v28  ;;  %v765_v28 = vld [vmem:[%s1884_s30 + $0x80] sm:$0xff] }
  0xce   : > { %683 = vmax.xlane.f32.xlu1 %v672_v30  ;;  %681 = vmax.xlane.f32.xlu0 %v671_v31 }
  0xcf   : > { %v520_v33 = vpop.f32.mrf.mxu1 }
  0xd0   : > { %v662_v34 = vmul.f32 0.25, %v520_v33  ;;  %v805_v33 = vld [vmem:[%s1884_s30 + $0x1c0] sm:$0xff] }
  0xd1   : > { %v589_v35 = vpop.f32.mrf.mxu2  ;;  %v658_v38 = vpop.f32.mrf.mxu3  ;;  %944 = vmatpush.msra.mxu3 %v805_v33  ;;  %v872_v33 = vld [vmem:[%s1884_s30 + $0x3d8] sm:$0xff] }
  0xd2   : > { %v670_v36 = vadd.f32 %v662_v34, %v1927_v27  ;;  %v668_v40 = vmul.f32 0.25, %v658_v38  ;;  %v665_v47 = vmul.f32 0.25, %v589_v35  ;;  %v788_v34 = vld [vmem:[%s1884_s30 + $0x138] sm:$0xff]  ;;  %v758_v38 = vld [vmem:[%s1884_s30 + $0x48] sm:$0xff] }
  0xd3   : > { %925 = vmatpush.msrb.mxu2 %v788_v34  ;;  %883 = vmatpush.msra.mxu0 %v758_v38  ;;  %v827_v34 = vld [vmem:[%s1884_s30 + $0x270] sm:$0xff] }
  0xd4   : > { %v1937_v45 = vadd.f32 %v668_v40, %v1927_v27  ;;  %v1946_v48 = vadd.f32 %v665_v47, %v1927_v27  ;;  %v787_v40 = vld [vmem:[%s1884_s30 + $0x130] sm:$0xff] }
  0xd5   : > { %926 = vmatpush.msrb.mxu2 %v787_v40  ;;  %v871_v38 = vld [vmem:[%s1884_s30 + $0x3d0] sm:$0xff]  ;;  %v842_v40 = vld [vmem:[%s1884_s30 + $0x2e8] sm:$0xff] }
  0xd6   : > { %679 = vmax.xlane.f32.xlu1 %v670_v36  ;;  %677 = vmax.xlane.f32.xlu0 %v669_v37 }
  0xd7   : > { %v612_v39 = vpop.f32.mrf.mxu1 }
  0xd8   : > { %v666_v41 = vmul.f32 0.25, %v612_v39  ;;  %v804_v39 = vld [vmem:[%s1884_s30 + $0x1b8] sm:$0xff] }
  0xd9   : > { %v635_v42 = vpop.f32.mrf.mxu2  ;;  %945 = vmatpush.msra.mxu3 %v804_v39  ;;  %v826_v39 = vld [vmem:[%s1884_s30 + $0x268] sm:$0xff] }
  0xda   : > { %v667_v43 = vmul.f32 0.25, %v635_v42  ;;  %v1934_v44 = vadd.f32 %v666_v41, %v1927_v27  ;;  %v774_v42 = vld [vmem:[%s1884_s30 + $0xc8] sm:$0xff] }
  0xdc   : > { %v1940_v46 = vadd.f32 %v667_v43, %v1927_v27  ;;  %v757_v43 = vld [vmem:[%s1884_s30 + $0x40] sm:$0xff] }
  0xdd   : > { %884 = vmatpush.msra.mxu0 %v757_v43  ;;  %v825_v43 = vld [vmem:[%s1884_s30 + $0x260] sm:$0xff] }
  0xde   : > { %689 = vmax.xlane.f32.xlu2 %v1940_v46  ;;  %687 = vmax.xlane.f32.xlu1 %v1934_v44 }
  0xdf   : > { %691 = vmax.xlane.f32.xlu0 %v1937_v45 }
  0xe6   : > { %685 = vmax.xlane.f32.xlu2 %v1946_v48 }
 0x141   : > { %v684_v49 = vpop.xlane.xlu1 %683  ;;  %v682_v50 = vpop.xlane.xlu0 %681 }
 0x142   : > { %v696_v51 = vsub.f32 %v672_v30, %v684_v49  ;;  %v695_v52 = vsub.f32 %v671_v31, %v682_v50  ;;  %v773_v49 = vld [vmem:[%s1884_s30 + $0xc0] sm:$0xff]  ;;  %v756_v50 = vld [vmem:[%s1884_s30 + $0x38] sm:$0xff] }
 0x143   : > { %885 = vmatpush.msra.mxu0 %v756_v50  ;;  %v840_v50 = vld [vmem:[%s1884_s30 + $0x2d8] sm:$0xff] }
 0x144   : > { %v707_v53 = vmul.f32 1.442695, %v696_v51  ;;  %v705_v54 = vmul.f32 1.442695, %v695_v52  ;;  %v802_v51 = vld [vmem:[%s1884_s30 + $0x1a8] sm:$0xff]  ;;  %v785_v52 = vld [vmem:[%s1884_s30 + $0x120] sm:$0xff] }
 0x145   : > { %886 = vmatpush.msra.mxu0 %v755_v58  ;;  %v850_v58 = vld [vmem:[%s1884_s30 + $0x328] sm:$0xff] }
 0x146   : > { %1407 = vpow2.f32 %v707_v53 }
 0x147   : > { %1409 = vpow2.f32 %v705_v54  ;;  %v772_v54 = vld [vmem:[%s1884_s30 + $0xb8] sm:$0xff] }
 0x149   : > { %v680_v62 = vpop.xlane.xlu1 %679  ;;  %v678_v63 = vpop.xlane.xlu0 %677 }
 0x14a   : > { %v694_v1 = vsub.f32 %v670_v36, %v680_v62  ;;  %v693_v2 = vsub.f32 %v669_v37, %v678_v63  ;;  %v775_v37 = vld [vmem:[%s1884_s30 + $0xd0] sm:$0xff]  ;;  %v754_v63 = vld [vmem:[%s1884_s30 + $0x28] sm:$0xff] }
 0x14b   : > { %902 = vmatpush.msrb.mxu1 %v775_v37  ;;  %v783_v62 = vld [vmem:[%s1884_s30 + $0x110] sm:$0xff]  ;;  %887 = vmatpush.msra.mxu0 %v754_v63  ;;  %v849_v63 = vld [vmem:[%s1884_s30 + $0x320] sm:$0xff] }
 0x14c   : > { %v1961_v7 = vpop.eup %1407  ;;  %v703_v8 = vmul.f32 1.442695, %v694_v1  ;;  %v701_v9 = vmul.f32 1.442695, %v693_v2  ;;  %v770_v1 = vld [vmem:[%s1884_s30 + $0xa8] sm:$0xff]  ;;  %v855_v37 = vld [vmem:[%s1884_s30 + $0x350] sm:$0xff] }
 0x14d   : > { %v1965_v12 = vpop.eup %1409  ;;  %723 = vadd.xlane.f32.xlu1 %v1961_v7  ;;  %903 = vmatpush.msrb.mxu1 %v774_v42  ;;  %v782_v2 = vld [vmem:[%s1884_s30 + $0x108] sm:$0xff] }
 0x14e   : > { %1411 = vpow2.f32 %v703_v8  ;;  %721 = vadd.xlane.f32.xlu2 %v1965_v12  ;;  %888 = vmatpush.msra.mxu0 %v753_v3  ;;  %v781_v8 = vld [vmem:[%s1884_s30 + $0x100] sm:$0xff]  ;;  %v870_v42 = vld [vmem:[%s1884_s30 + $0x3c8] sm:$0xff]  ;;  %v848_v3 = vld [vmem:[%s1884_s30 + $0x318] sm:$0xff] }
 0x14f   : > { %1413 = vpow2.f32 %v701_v9  ;;  %904 = vmatpush.msrb.mxu1 %v773_v49  ;;  %v797_v9 = vld [vmem:[%s1884_s30 + $0x180] sm:$0xff]  ;;  %v824_v49 = vld [vmem:[%s1884_s30 + $0x258] sm:$0xff] }
 0x150   : > { %889 = vmatpush.msra.mxu0 %v752_v14  ;;  %v834_v14 = vld [vmem:[%s1884_s30 + $0x2a8] sm:$0xff] }
 0x151   : > { %v690_v21 = vpop.xlane.xlu2 %689  ;;  %v688_v32 = vpop.xlane.xlu1 %687  ;;  %905 = vmatpush.msrb.mxu1 %v772_v54  ;;  %v851_v54 = vld [vmem:[%s1884_s30 + $0x330] sm:$0xff] }
 0x152   : > { %v699_v24 = vsub.f32 %v1940_v46, %v690_v21  ;;  %v692_v25 = vpop.xlane.xlu0 %691  ;;  %v698_v41 = vsub.f32 %v1934_v44, %v688_v32  ;;  %v786_v46 = vld [vmem:[%s1884_s30 + $0x128] sm:$0xff]  ;;  %890 = vmatpush.msra.mxu0 %v751_v18  ;;  %v856_v32 = vld [vmem:[%s1884_s30 + $0x358] sm:$0xff]  ;;  %v833_v18 = vld [vmem:[%s1884_s30 + $0x2a0] sm:$0xff] }
 0x153   : > { %v700_v29 = vsub.f32 %v1937_v45, %v692_v25  ;;  %v803_v45 = vld [vmem:[%s1884_s30 + $0x1b0] sm:$0xff]  ;;  %927 = vmatpush.msrb.mxu2 %v786_v46  ;;  %906 = vmatpush.msrb.mxu1 %v771_v61  ;;  %v874_v21 = vld [vmem:[%s1884_s30 + $0x3e8] sm:$0xff]  ;;  %v873_v25 = vld [vmem:[%s1884_s30 + $0x3e0] sm:$0xff] }
 0x154   : > { %v1983_v30 = vpop.eup %1411  ;;  %v713_v31 = vmul.f32 1.442695, %v699_v24  ;;  %v711_v53 = vmul.f32 1.442695, %v698_v41  ;;  %946 = vmatpush.msra.mxu3 %v803_v45  ;;  %891 = vmatpush.msra.mxu0 %v750_v22  ;;  %v857_v24 = vld [vmem:[%s1884_s30 + $0x360] sm:$0xff]  ;;  %v854_v41 = vld [vmem:[%s1884_s30 + $0x348] sm:$0xff] }
 0x155   : > { %v1987_v35 = vpop.eup %1413  ;;  %v715_v36 = vmul.f32 1.442695, %v700_v29  ;;  %928 = vmatpush.msrb.mxu2 %v785_v52  ;;  %907 = vmatpush.msrb.mxu1 %v770_v1  ;;  %v828_v29 = vld [vmem:[%s1884_s30 + $0x278] sm:$0xff]  ;;  %v841_v45 = vld [vmem:[%s1884_s30 + $0x2e0] sm:$0xff]  ;;  %v823_v52 = vld [vmem:[%s1884_s30 + $0x250] sm:$0xff] }
 0x156   : > { %1415 = vpow2.f32 %v713_v31  ;;  %719 = vadd.xlane.f32.xlu2 %v1983_v30  ;;  %717 = vadd.xlane.f32.xlu0 %v1987_v35  ;;  %v844_v31 = vld [vmem:[%s1884_s30 + $0x2f8] sm:$0xff]  ;;  %v853_v46 = vld [vmem:[%s1884_s30 + $0x340] sm:$0xff] }
 0x157   : > { %1417 = vpow2.f32 %v715_v36  ;;  %947 = vmatpush.msra.mxu3 %v802_v51  ;;  %908 = vmatpush.msrb.mxu1 %v769_v5  ;;  %v843_v36 = vld [vmem:[%s1884_s30 + $0x2f0] sm:$0xff]  ;;  %v868_v51 = vld [vmem:[%s1884_s30 + $0x3b8] sm:$0xff]  ;;  %v821_v61 = vld [vmem:[%s1884_s30 + $0x240] sm:$0xff] }
 0x158   : > { %892 = vmatpush.msra.mxu0 %v749_v26  ;;  %v820_v1 = vld [vmem:[%s1884_s30 + $0x238] sm:$0xff]  ;;  %v819_v5 = vld [vmem:[%s1884_s30 + $0x230] sm:$0xff]  ;;  %v814_v26 = vld [vmem:[%s1884_s30 + $0x208] sm:$0xff] }
 0x159   : > { %v686_v47 = vpop.xlane.xlu2 %685  ;;  %948 = vmatpush.msra.mxu3 %v801_v57  ;;  %909 = vmatpush.msrb.mxu1 %v768_v15  ;;  %v822_v57 = vld [vmem:[%s1884_s30 + $0x248] sm:$0xff]  ;;  %v832_v22 = vld [vmem:[%s1884_s30 + $0x298] sm:$0xff] }
 0x15a   : > { %v697_v44 = vsub.f32 %v1946_v48, %v686_v47  ;;  %v784_v48 = vld [vmem:[%s1884_s30 + $0x118] sm:$0xff]  ;;  %957 = vmatpush.msrb.mxu0 %v828_v29  ;;  %v869_v47 = vld [vmem:[%s1884_s30 + $0x3c0] sm:$0xff]  ;;  %v846_v15 = vld [vmem:[%s1884_s30 + $0x308] sm:$0xff] }
 0x15b   : > { %929 = vmatpush.msrb.mxu2 %v784_v48  ;;  %949 = vmatpush.msra.mxu3 %v800_v60  ;;  %v838_v48 = vld [vmem:[%s1884_s30 + $0x2c8] sm:$0xff] }
 0x15c   : > { %v2006_v55 = vpop.eup %1415  ;;  %v709_v56 = vmul.f32 1.442695, %v697_v44  ;;  %910 = vmatpush.msrb.mxu1 %v767_v19  ;;  %958 = vmatpush.msrb.mxu0 %v827_v34  ;;  %v852_v44 = vld [vmem:[%s1884_s30 + $0x338] sm:$0xff]  ;;  %v866_v60 = vld [vmem:[%s1884_s30 + $0x3a8] sm:$0xff]  ;;  %v845_v19 = vld [vmem:[%s1884_s30 + $0x300] sm:$0xff] }
 0x15d   : > { %v2011_v59 = vpop.eup %1417  ;;  %930 = vmatpush.msrb.mxu2 %v783_v62  ;;  %950 = vmatpush.msra.mxu3 %v799_v0  ;;  %v837_v62 = vld [vmem:[%s1884_s30 + $0x2c0] sm:$0xff] }
 0x15e   : > { %1419 = vpow2.f32 %v709_v56  ;;  %729 = vadd.xlane.f32.xlu0 %v2006_v55  ;;  %731 = vadd.xlane.f32.xlu2 %v2011_v59  ;;  %v867_v56 = vld [vmem:[%s1884_s30 + $0x3b0] sm:$0xff]  ;;  %v865_v0 = vld [vmem:[%s1884_s30 + $0x3a0] sm:$0xff] }
 0x15f   : > { %1421 = vpow2.f32 %v711_v53  ;;  %931 = vmatpush.msrb.mxu2 %v782_v2  ;;  %951 = vmatpush.msra.mxu3 %v798_v4  ;;  %v839_v53 = vld [vmem:[%s1884_s30 + $0x2d0] sm:$0xff]  ;;  %v836_v2 = vld [vmem:[%s1884_s30 + $0x2b8] sm:$0xff] }
 0x160   : > { %911 = vmatpush.msrb.mxu1 %v766_v23  ;;  %959 = vmatpush.msrb.mxu0 %v826_v39  ;;  %v864_v4 = vld [vmem:[%s1884_s30 + $0x398] sm:$0xff]  ;;  %v815_v23 = vld [vmem:[%s1884_s30 + $0x210] sm:$0xff] }
 0x161   : > { %932 = vmatpush.msrb.mxu2 %v781_v8  ;;  %952 = vmatpush.msra.mxu3 %v797_v9  ;;  %v835_v8 = vld [vmem:[%s1884_s30 + $0x2b0] sm:$0xff] }
 0x162   : > { %912 = vmatpush.msrb.mxu1 %v765_v28  ;;  %960 = vmatpush.msrb.mxu0 %v825_v43  ;;  %v847_v9 = vld [vmem:[%s1884_s30 + $0x310] sm:$0xff]  ;;  %v830_v28 = vld [vmem:[%s1884_s30 + $0x288] sm:$0xff] }
 0x163   : > { %997 = vmatpush.msra.mxu2 %v860_v11  ;;  %1017 = vmatpush.msrb.mxu3 %v876_v13  ;;  %v863_v11 = vld [vmem:[%s1884_s30 + $0x390] sm:$0xff]  ;;  %v818_v13 = vld [vmem:[%s1884_s30 + $0x228] sm:$0xff] }
 0x164   : > { %v2025_v6 = vpop.eup %1419  ;;  %977 = vmatpush.msra.mxu1 %v844_v31  ;;  %961 = vmatpush.msrb.mxu0 %v824_v49  ;;  %v813_v31 = vld [vmem:[%s1884_s30 + $0x200] sm:$0xff] }
 0x165   : > { %v2029_v10 = vpop.eup %1421  ;;  %725 = vadd.xlane.f32.xlu1 %v2025_v6  ;;  %998 = vmatpush.msra.mxu2 %v859_v16  ;;  %v862_v16 = vld [vmem:[%s1884_s30 + $0x388] sm:$0xff] }
 0x166   : > { %727 = vadd.xlane.f32.xlu0 %v2029_v10  ;;  %1018 = vmatpush.msrb.mxu3 %v875_v17  ;;  %v817_v17 = vld [vmem:[%s1884_s30 + $0x220] sm:$0xff] }
 0x167   : > { %999 = vmatpush.msra.mxu2 %v858_v20  ;;  %978 = vmatpush.msra.mxu1 %v843_v36  ;;  %v861_v20 = vld [vmem:[%s1884_s30 + $0x380] sm:$0xff] }
 0x168   : > { %1019 = vmatpush.msrb.mxu3 %v874_v21  ;;  %962 = vmatpush.msrb.mxu0 %v823_v52  ;;  %v816_v21 = vld [vmem:[%s1884_s30 + $0x218] sm:$0xff] }
 0x169   : > { %1000 = vmatpush.msra.mxu2 %v857_v24  ;;  %979 = vmatpush.msra.mxu1 %v842_v40  ;;  %v831_v24 = vld [vmem:[%s1884_s30 + $0x290] sm:$0xff] }
 0x16a   : > { %1020 = vmatpush.msrb.mxu3 %v873_v25  ;;  %963 = vmatpush.msrb.mxu0 %v822_v57  ;;  %v1059_v57 = vld [vmem:[%s1886_s19 + $0x50] sm:$0xff] }
 0x16b   : > { %1001 = vmatpush.msra.mxu2 %v856_v32  ;;  %980 = vmatpush.msra.mxu1 %v841_v45  ;;  %v829_v32 = vld [vmem:[%s1884_s30 + $0x280] sm:$0xff] }
 0x16c   : > { %1021 = vmatpush.msrb.mxu3 %v872_v33  ;;  %964 = vmatpush.msrb.mxu0 %v821_v61  ;;  %v1053_v61 = vld [vmem:[%s1886_s19 + $0x20] sm:$0xff] }
 0x16d   : > { %1002 = vmatpush.msra.mxu2 %v855_v37  ;;  %981 = vmatpush.msra.mxu1 %v840_v50 }
 0x16e   : > { %1022 = vmatpush.msrb.mxu3 %v871_v38  ;;  %965 = vmatpush.msrb.mxu0 %v820_v1  ;;  %v1049_v1 = vld [vmem:[%s1886_s19] sm:$0xff] }
 0x16f   : > { %1003 = vmatpush.msra.mxu2 %v854_v41  ;;  %982 = vmatpush.msra.mxu1 %v839_v53 }
 0x170   : > { %1023 = vmatpush.msrb.mxu3 %v870_v42  ;;  %966 = vmatpush.msrb.mxu0 %v819_v5 }
 0x171   : > { %1004 = vmatpush.msra.mxu2 %v853_v46  ;;  %983 = vmatpush.msra.mxu1 %v838_v48  ;;  %v1056_v48 = vld [vmem:[%s1886_s19 + $0x38] sm:$0xff] }
 0x172   : > { %1024 = vmatpush.msrb.mxu3 %v869_v47  ;;  %967 = vmatpush.msrb.mxu0 %v818_v13  ;;  %v1064_v47 = vld [vmem:[%s1886_s19 + $0x78] sm:$0xff] }
 0x173   : > { %1005 = vmatpush.msra.mxu2 %v852_v44  ;;  %984 = vmatpush.msra.mxu1 %v837_v62  ;;  %v1052_v62 = vld [vmem:[%s1886_s19 + $0x18] sm:$0xff] }
 0x174   : > { %1025 = vmatpush.msrb.mxu3 %v868_v51  ;;  %968 = vmatpush.msrb.mxu0 %v817_v17 }
 0x175   : > { %1006 = vmatpush.msra.mxu2 %v851_v54  ;;  %985 = vmatpush.msra.mxu1 %v836_v2  ;;  %v1063_v54 = vld [vmem:[%s1886_s19 + $0x70] sm:$0xff] }
 0x176   : > { %1026 = vmatpush.msrb.mxu3 %v867_v56  ;;  %969 = vmatpush.msrb.mxu0 %v816_v21  ;;  %v1060_v56 = vld [vmem:[%s1886_s19 + $0x58] sm:$0xff] }
 0x177   : > { %1007 = vmatpush.msra.mxu2 %v850_v58  ;;  %986 = vmatpush.msra.mxu1 %v835_v8  ;;  %v1055_v58 = vld [vmem:[%s1886_s19 + $0x30] sm:$0xff] }
 0x178   : > { %1027 = vmatpush.msrb.mxu3 %v866_v60  ;;  %970 = vmatpush.msrb.mxu0 %v815_v23  ;;  %v1054_v60 = vld [vmem:[%s1886_s19 + $0x28] sm:$0xff] }
 0x179   : > { %1008 = vmatpush.msra.mxu2 %v849_v63  ;;  %987 = vmatpush.msra.mxu1 %v834_v14  ;;  %v1051_v63 = vld [vmem:[%s1886_s19 + $0x10] sm:$0xff] }
 0x17a   : > { %1028 = vmatpush.msrb.mxu3 %v865_v0  ;;  %971 = vmatpush.msrb.mxu0 %v814_v26  ;;  %v1050_v0 = vld [vmem:[%s1886_s19 + $0x8] sm:$0xff] }
 0x17b   : > { %1009 = vmatpush.msra.mxu2 %v848_v3  ;;  %988 = vmatpush.msra.mxu1 %v833_v18 }
 0x17c   : > { %1029 = vmatpush.msrb.mxu3 %v864_v4  ;;  %972 = vmatpush.msrb.mxu0 %v813_v31 }
 0x17d   : > { %1010 = vmatpush.msra.mxu2 %v847_v9  ;;  %989 = vmatpush.msra.mxu1 %v832_v22 }
 0x17e   : > { %1030 = vmatpush.msrb.mxu3 %v863_v11 }
 0x17f   : > { %1011 = vmatpush.msra.mxu2 %v846_v15  ;;  %990 = vmatpush.msra.mxu1 %v831_v24 }
 0x180   : > { %1031 = vmatpush.msrb.mxu3 %v862_v16 }
 0x181   : > { %1012 = vmatpush.msra.mxu2 %v845_v19  ;;  %991 = vmatpush.msra.mxu1 %v830_v28  ;;  %v1406_v19 = vld [vmem:[%s2178_s5] ss:$0 sm:$0xff] }
 0x182   : > { %1032 = vmatpush.msrb.mxu3 %v861_v20 }
 0x183   : > { %992 = vmatpush.msra.mxu1 %v829_v32 }
 0x1c0   : > { %v724_v25 = vpop.xlane.xlu1 %723 }
 0x1c1   : > { %v722_v29 = vpop.xlane.xlu2 %721  ;;  %1423 = vrcp.f32 %v724_v25 }
 0x1c2   : > { %1425 = vrcp.f32 %v722_v29 }
 0x1c7   : > { %v1424_v33 = vpop.eup %1423 }
 0x1c8   : > { %v1426_v34 = vpop.eup %1425  ;;  %v744_v36 = vmul.f32 %v1424_v33, %v1961_v7 }
 0x1c9   : > { %v720_v37 = vpop.xlane.xlu2 %719  ;;  %v718_v38 = vpop.xlane.xlu0 %717  ;;  %v743_v39 = vmul.f32 %v1426_v34, %v1965_v12 }
 0x1ca   : > { %1427 = vrcp.f32 %v720_v37  ;;  %953 = vmatmul.f32.vlgmr.msra.gmra.mxu3 %v744_v36 }
 0x1cb   : > { %1429 = vrcp.f32 %v718_v38  ;;  %933 = vmatmul.f32.vlgmr.msrb.gmra.mxu2 %v743_v39 }
 0x1d0   : > { %v1428_v40 = vpop.eup %1427 }
 0x1d1   : > { %v1430_v41 = vpop.eup %1429  ;;  %v730_v42 = vpop.xlane.xlu0 %729  ;;  %v742_v43 = vmul.f32 %v1428_v40, %v1983_v30 }
 0x1d2   : > { %v732_v45 = vpop.xlane.xlu2 %731  ;;  %1431 = vrcp.f32 %v730_v42  ;;  %v741_v46 = vmul.f32 %v1430_v41, %v1987_v35 }
 0x1d3   : > { %1433 = vrcp.f32 %v732_v45  ;;  %913 = vmatmul.f32.vlgmr.msrb.gmra.mxu1 %v742_v43 }
 0x1d4   : > { %893 = vmatmul.f32.vlgmr.msra.gmra.mxu0 %v741_v46 }
 0x1d5   : > { %1065 = vmatpush.msra.mxu0 %v1064_v47 }
 0x1d7   : > { %1066 = vmatpush.msra.mxu0 %v1063_v54 }
 0x1d8   : > { %v1432_v7 = vpop.eup %1431  ;;  %v726_v12 = vpop.xlane.xlu1 %725 }
 0x1d9   : > { %v1434_v49 = vpop.eup %1433  ;;  %1435 = vrcp.f32 %v726_v12  ;;  %v728_v50 = vpop.xlane.xlu0 %727  ;;  %v747_v44 = vmul.f32 %v1432_v7, %v2006_v55  ;;  %v1062_v55 = vld [vmem:[%s1886_s19 + $0x68] sm:$0xff] }
 0x1da   : > { %v748_v30 = vmul.f32 %v1434_v49, %v2011_v59  ;;  %1437 = vrcp.f32 %v728_v50  ;;  %1067 = vmatpush.msra.mxu0 %v1062_v55  ;;  %v1061_v59 = vld [vmem:[%s1886_s19 + $0x60] sm:$0xff] }
 0x1db   : > { %1013 = vmatmul.f32.vlgmr.msra.gmra.mxu2 %v747_v44 }
 0x1dc   : > { %1033 = vmatmul.f32.vlgmr.msrb.gmra.mxu3 %v748_v30  ;;  %1068 = vmatpush.msra.mxu0 %v1061_v59 }
 0x1de   : > { %1069 = vmatpush.msra.mxu0 %v1060_v56 }
 0x1df   : > { %v1436_v35 = vpop.eup %1435 }
 0x1e0   : > { %v1438_v51 = vpop.eup %1437  ;;  %v745_v52 = vmul.f32 %v1436_v35, %v2025_v6  ;;  %v1058_v6 = vld [vmem:[%s1886_s19 + $0x48] sm:$0xff]  ;;  %1070 = vmatpush.msra.mxu0 %v1059_v57 }
 0x1e1   : > { %v746_v53 = vmul.f32 %v1438_v51, %v2029_v10  ;;  %v1057_v10 = vld [vmem:[%s1886_s19 + $0x40] sm:$0xff] }
 0x1e2   : > { %973 = vmatmul.f32.vlgmr.msrb.gmra.mxu0 %v745_v52 }
 0x1e3   : > { %993 = vmatmul.f32.vlgmr.msra.gmra.mxu1 %v746_v53  ;;  %1071 = vmatpush.msra.mxu0 %v1058_v6 }
 0x1e5   : > { %1072 = vmatpush.msra.mxu0 %v1057_v10 }
 0x1e7   : > { %1073 = vmatpush.msra.mxu0 %v1056_v48 }
 0x1e9   : > { %1074 = vmatpush.msra.mxu0 %v1055_v58 }
 0x1eb   : > { %1075 = vmatpush.msra.mxu0 %v1054_v60 }
 0x1ed   : > { %1076 = vmatpush.msra.mxu0 %v1053_v61 }
 0x1ef   : > { %1077 = vmatpush.msra.mxu0 %v1052_v62 }
 0x1f1   : > { %1078 = vmatpush.msra.mxu0 %v1051_v63 }
 0x1f3   : > { %1079 = vmatpush.msra.mxu0 %v1050_v0 }
 0x1f5   : > { %1080 = vmatpush.msra.mxu0 %v1049_v1 }
 0x24d   : > { %v954_v9 = vpop.f32.mrf.mxu3 }
 0x24e   : > { %v934_v5 = vpop.f32.mrf.mxu2 }
 0x250   : > { %v914_v3 = vpop.f32.mrf.mxu1 }
 0x251   : > { %v894_v2 = vpop.f32.mrf.mxu0 }
 0x252   : > { %v1037_v4 = vadd.f32 %v914_v3, %v894_v2 }
 0x254   : > { %v1038_v8 = vadd.f32 %v1037_v4, %v934_v5 }
 0x256   : > { %v1039_v11 = vadd.f32 %v1038_v8, %v954_v9 }
 0x25e   : > { %v1014_v17 = vpop.f32.mrf.mxu2 }
 0x25f   : > { %v974_v13 = vpop.f32.mrf.mxu0  ;;  %v1034_v20 = vpop.f32.mrf.mxu3 }
 0x260   : > { %v1040_v14 = vadd.f32 %v1039_v11, %v974_v13  ;;  %v994_v15 = vpop.f32.mrf.mxu1 }
 0x262   : > { %v1041_v16 = vadd.f32 %v1040_v14, %v994_v15 }
 0x264   : > { %v1042_v18 = vadd.f32 %v1041_v16, %v1014_v17 }
 0x266   : > { %v1043_v21 = vadd.f32 %v1042_v18, %v1034_v20 }
 0x268   : > { %v1048_v22 = vadd.f32 %v1406_v19, %v1043_v21 }
 0x26a   : > { %1081 = vmatmul.f32.vlgmr.msra.gmra.mxu0 %v1048_v22 }
 0x2e7   : > { %v1082_v23 = vpop.f32.mrf.mxu0 }
 0x2e8   : > { %v1085_v24 = vmul.f32 0.088388346, %v1082_v23 }
 0x2ea   : > { %1439 = vtanh.f32 %v1085_v24 }
 0x2f0   : > { %v1440_v25 = vpop.eup %1439 }
 0x2f1   : > { %v1087_v26 = vmul.f32 10.0, %v1440_v25 }
 0x2f3   : > { %v1088_v28 = vadd.f32 %v1087_v26, %v1927_v27 }
 0x2f5   : > { %v1089_v29 = vmul.f32 1.442695, %v1088_v28 }
 0x2f7   : > { %1441 = vpow2.f32 %v1089_v29 }
 0x2fd   : > { %v1442_v31 = vpop.eup %1441 }
 0x2fe   : > { %1091 = vadd.xlane.f32.xlu1 %v1442_v31 }
 0x371   : > { %v1092_v32 = vpop.xlane.xlu1 %1091 }
 0x372   : > { %1443 = vrcp.f32 %v1092_v32 }
 0x378   : > { %v1444_v33 = vpop.eup %1443 }
 0x379   : > { %v1094_v34 = vmul.f32 %v1444_v33, %v1442_v31 }
 0x37b   : > { %1095 = vst [vmem:[%s450_s15] sm:$0xff] %v1094_v34 }
 0x37c   : > { %1622 = shalt.err (!%p1619_p13)
}
 0x37d   : > { %1332 = dma.vmem_to_hbm [thread:$0]  (%p1779_p9), %s1111_s26, 128, %s1113_s17, %s1097_s29  }
 0x37e PF: > { %s2204_s13 = sld [smem:[#allocation16_spill]]  ;;  %p1351_p0 = pnand %p1284_p12, %p1786_p11 }
 0x37f   : > { %s2206_s30 = sld [smem:[#allocation18_spill]] }
 0x380   : > { %p1352_p1 = pneg %p1351_p0 }
 0x384   : > { %s1124_s1 = sand.u32 1, %s2204_s13  }
 0x385   : > { %s1125_s19 = scalar_lea.sflag [#allocation4], %s1124_s1 }
 0x386   : > { %1660 = dma.done.wait (%p1352_p1), %s1125_s19, 128  }
 0x387   : > { %1662 = vsyncadd (%p1352_p1), %s1125_s19, 4294967168  ;;  %s28_s26 = sadd.s32 1, %s2206_s30   ;;  %s2207_s27 = sld [smem:[#allocation17_spill]] }
 0x388   : > { %p25_p2 = scmp.ge.s32.totalorder %s28_s26, 4   ;;  %s2208_s23 = sld [smem:[#allocation20_spill]] }
 0x389   : > { %s2209_s10 = sld [smem:[#allocation19_spill]]  ;;  %s2210_s21 = smov %s1669_s22 }
 0x38a   : > { %s2212_s24 = smov %s1681_s25 }
 0x38b   :  { %27 = sbr.rel (!%p25_p2) target bundleno = 14 (0xe), region = 137 }
 0x38d   : > { %s2211_s22 = smov %s2207_s27 }
 0x38f   : > { %s2213_s25 = smov %s2209_s10 }
 0x390   :  { %1131 = vsyncpa [#allocation3], 1 }
 0x391   :  { %1133 = vsyncpa [#allocation3 + $0x1], 1 }
 0x392   :  { %1134 = vsyncpa [#allocation6], 1 }
 0x393   :  { %1136 = vsyncpa [#allocation6 + $0x1], 1 }
 0x394   :  { %1137 = vsyncpa [#allocation9], 1 }
 0x395   :  { %1139 = vsyncpa [#allocation9 + $0x1], 1 }
 0x396   :  { %1140 = vsyncpa [#allocation4], 1 }
 0x397   :  { %1142 = vsyncpa [#allocation4 + $0x1], 1 }

</bundles_post_ra>
